<compile_context>
chip_gen: v5e
topology: v5e:2x2
jax: 0.10.0
libtpu: 0.0.40
codegen_flags: <defaults>
</compile_context>

<pallas_src>
import functools

import jax
import jax.numpy as jnp
from jax.experimental import pallas as pl
from jax.experimental.pallas import tpu as pltpu


def _make_decomp_kernel(T, kernel_size):
    pad = (kernel_size - 1) // 2
    inv_k = 1.0 / float(kernel_size)

    def kernel(x_ref, res_ref, mean_ref):
        # x_ref / res_ref / mean_ref: [rows, T]; time runs along the lane axis.
        x = x_ref[...].astype(jnp.float32)
        rows = x.shape[0]

        acc = x  # s = 0 tap
        if pad > 0:
            col = jax.lax.broadcasted_iota(jnp.int32, (rows, T), dimension=1)
            # Edge values, broadcast once (hoisted out of the tap loop).
            left = jnp.broadcast_to(x[:, 0:1], (rows, T))
            right = jnp.broadcast_to(x[:, T - 1:T], (rows, T))
            for s in range(1, pad + 1):
                if s >= T:
                    # Window reaches entirely past the edge on both sides:
                    # both taps are pure edge replication.
                    acc = acc + left + right
                    continue
                # +s tap: value at t is x[t + s], right-edge replicated.
                fwd = pltpu.roll(x, shift=T - s, axis=1)
                acc = acc + jnp.where(col < T - s, fwd, right)
                # -s tap: value at t is x[t - s], left-edge replicated.
                bwd = pltpu.roll(x, shift=s, axis=1)
                acc = acc + jnp.where(col >= s, bwd, left)

        mean = acc * inv_k
        mean_ref[...] = mean.astype(mean_ref.dtype)
        res_ref[...] = (x - mean).astype(res_ref.dtype)

    return kernel


def _choose_block_rows(n_rows, row_bytes):
    """~1 MiB input blocks, sublane-multiple rows, >=2 grid steps if possible."""
    target = max(8, ((1 << 20) // max(row_bytes, 1)) // 8 * 8)
    half = -(-n_rows // 2)            # ceil(n_rows / 2)
    half = max(8, -(-half // 8) * 8)  # rounded up to a sublane multiple
    return min(target, half)


def series_decomp_forward(x, kernel_size):
    """x: [B, T, C]. Returns (res, moving_mean), each [B, T, C] (same dtype)."""
    B, T, C = x.shape
    if kernel_size % 2 != 1:
        # TODO(synk): even kernel_size makes PyTorch's AvgPool output length
        # T-1, so `x - moving_mean` shape-mismatches; only odd sizes supported.
        raise ValueError("series_decomp requires an odd kernel_size")

    # Lane-dense re-layout: time on the 128-lane axis, (batch*channel) rows on
    # the sublane axis.
    # TODO(synk): if C is a large d_model (>=128), a native-[B,T,C] variant
    # that tiles C in 128-lane chunks would avoid the transpose passes.
    rows = B * C
    xt = jnp.transpose(x, (0, 2, 1)).reshape(rows, T)

    blk = _choose_block_rows(rows, T * xt.dtype.itemsize)
    grid = -(-rows // blk)
    rows_padded = grid * blk
    if rows_padded != rows:
        xt = jnp.pad(xt, ((0, rows_padded - rows), (0, 0)))

    kernel = _make_decomp_kernel(T, kernel_size)
    spec = pl.BlockSpec((blk, T), lambda i: (i, 0))

    itemsize = x.dtype.itemsize
    cost = pl.CostEstimate(
        flops=(2 * ((kernel_size - 1) // 2) + 2) * B * T * C,
        transcendentals=0,
        bytes_accessed=3 * B * T * C * itemsize,
    )

    res_t, mean_t = pl.pallas_call(
        kernel,
        out_shape=(
            jax.ShapeDtypeStruct((rows_padded, T), x.dtype),
            jax.ShapeDtypeStruct((rows_padded, T), x.dtype),
        ),
        grid_spec=pltpu.PrefetchScalarGridSpec(
            num_scalar_prefetch=0,
            grid=(grid,),
            in_specs=[spec],
            out_specs=(spec, spec),
        ),
        compiler_params=pltpu.CompilerParams(
            dimension_semantics=("parallel",),
            vmem_limit_bytes=32 * 1024 * 1024,
        ),
        cost_estimate=cost,
    )(xt)

    def _back(y):
        return jnp.transpose(y[:rows].reshape(B, C, T), (0, 2, 1))

    return _back(res_t), _back(mean_t)


def _reference_series_decomp(x, kernel_size):
    """Pure-JAX mirror of the PyTorch series_decomp forward."""
    pad = (kernel_size - 1) // 2
    T = x.shape[1]
    front = jnp.repeat(x[:, 0:1, :], pad, axis=1)
    end = jnp.repeat(x[:, -1:, :], pad, axis=1)
    xp = jnp.concatenate([front, x, end], axis=1)
    mean = sum(xp[:, k:k + T, :] for k in range(kernel_size)) / kernel_size
    res = x - mean
    return res, mean


if __name__ == "__main__":
    # Small shapes consistent with the module: batch=2, seq_len=16, channels=4,
    # moving-average kernel_size=5 (odd, as series_decomp requires).
    B, T, C, K = 2, 16, 4, 5

    key = jax.random.PRNGKey(0)
    x = jax.random.normal(key, (B, T, C), dtype=jnp.float32)

    fwd = jax.jit(functools.partial(series_decomp_forward, kernel_size=K))
    res, mean = fwd(x)
    res, mean = jax.block_until_ready((res, mean))

    res_ref, mean_ref = _reference_series_decomp(x, K)
    assert res.shape == (B, T, C), res.shape
    assert mean.shape == (B, T, C), mean.shape
    assert jnp.allclose(mean, mean_ref, atol=1e-5, rtol=1e-5), "moving_mean mismatch"
    assert jnp.allclose(res, res_ref, atol=1e-5, rtol=1e-5), "residual mismatch"

    print("KERNEL_OK")
</pallas_src>

<mosaic_0001>
module attributes {stable_mosaic.version = 11 : i64} {
  func.func @kernel(%arg0: i32, %arg1: memref<8x16xf32, #tpu.memory_space<vmem>>, %arg2: memref<8x16xf32, #tpu.memory_space<vmem>>, %arg3: memref<8x16xf32, #tpu.memory_space<vmem>>) attributes {dimension_semantics = [#tpu.dimension_semantics<parallel>], iteration_bounds = array<i64: 1>, scalar_prefetch = 0 : i64, scratch_operands = 0 : i64, tpu.core_type = #tpu.core_type<tc>, window_params = [{transform_indices = @transform_0, window_bounds = array<i64: 8, 16>}, {transform_indices = @transform_1, window_bounds = array<i64: 8, 16>}, {transform_indices = @transform_2, window_bounds = array<i64: 8, 16>}]} {
    %c0 = arith.constant 0 : index
    %c0_0 = arith.constant 0 : index
    %0 = vector.load %arg1[%c0, %c0_0] : memref<8x16xf32, #tpu.memory_space<vmem>>, vector<8x16xf32>
    %1 = tpu.iota {dimensions = array<i32: 1>} : vector<8x16xi32>
    %2 = vector.extract_strided_slice %0 {offsets = [0, 0], sizes = [8, 1], strides = [1, 1]} : vector<8x16xf32> to vector<8x1xf32>
    %3 = vector.shape_cast %2 : vector<8x1xf32> to vector<8x1xf32>
    %4 = vector.broadcast %3 : vector<8x1xf32> to vector<8x16xf32>
    %5 = vector.extract_strided_slice %0 {offsets = [0, 15], sizes = [8, 1], strides = [1, 1]} : vector<8x16xf32> to vector<8x1xf32>
    %6 = vector.shape_cast %5 : vector<8x1xf32> to vector<8x1xf32>
    %7 = vector.broadcast %6 : vector<8x1xf32> to vector<8x16xf32>
    %c15_i32 = arith.constant 15 : i32
    %8 = tpu.dynamic_rotate %0 by %c15_i32 dim 1 : vector<8x16xf32>, i32 -> vector<8x16xf32>
    %c15_i32_1 = arith.constant 15 : i32
    %9 = vector.broadcast %c15_i32_1 : i32 to vector<8x16xi32>
    %10 = arith.cmpi slt, %1, %9 : vector<8x16xi32>
    %11 = arith.select %10, %8, %7 : vector<8x16xi1>, vector<8x16xf32>
    %12 = arith.addf %0, %11 : vector<8x16xf32>
    %c1_i32 = arith.constant 1 : i32
    %13 = tpu.dynamic_rotate %0 by %c1_i32 dim 1 : vector<8x16xf32>, i32 -> vector<8x16xf32>
    %c1_i32_2 = arith.constant 1 : i32
    %14 = vector.broadcast %c1_i32_2 : i32 to vector<8x16xi32>
    %15 = arith.cmpi sge, %1, %14 : vector<8x16xi32>
    %16 = arith.select %15, %13, %4 : vector<8x16xi1>, vector<8x16xf32>
    %17 = arith.addf %12, %16 : vector<8x16xf32>
    %c14_i32 = arith.constant 14 : i32
    %18 = tpu.dynamic_rotate %0 by %c14_i32 dim 1 : vector<8x16xf32>, i32 -> vector<8x16xf32>
    %c14_i32_3 = arith.constant 14 : i32
    %19 = vector.broadcast %c14_i32_3 : i32 to vector<8x16xi32>
    %20 = arith.cmpi slt, %1, %19 : vector<8x16xi32>
    %21 = arith.select %20, %18, %7 : vector<8x16xi1>, vector<8x16xf32>
    %22 = arith.addf %17, %21 : vector<8x16xf32>
    %c2_i32 = arith.constant 2 : i32
    %23 = tpu.dynamic_rotate %0 by %c2_i32 dim 1 : vector<8x16xf32>, i32 -> vector<8x16xf32>
    %c2_i32_4 = arith.constant 2 : i32
    %24 = vector.broadcast %c2_i32_4 : i32 to vector<8x16xi32>
    %25 = arith.cmpi sge, %1, %24 : vector<8x16xi32>
    %26 = arith.select %25, %23, %4 : vector<8x16xi1>, vector<8x16xf32>
    %27 = arith.addf %22, %26 : vector<8x16xf32>
    %cst = arith.constant 2.000000e-01 : f32
    %28 = vector.broadcast %cst : f32 to vector<8x16xf32>
    %29 = arith.mulf %27, %28 : vector<8x16xf32>
    %c0_5 = arith.constant 0 : index
    %c0_6 = arith.constant 0 : index
    %30 = vector.load %arg3[%c0_5, %c0_6] : memref<8x16xf32, #tpu.memory_space<vmem>>, vector<8x16xf32>
    tpu.vector_store %arg3[%c0_5, %c0_6], %29 {strides = array<i32>} : memref<8x16xf32, #tpu.memory_space<vmem>>, vector<8x16xf32>,
    %31 = arith.subf %0, %29 : vector<8x16xf32>
    %c0_7 = arith.constant 0 : index
    %c0_8 = arith.constant 0 : index
    %32 = vector.load %arg2[%c0_7, %c0_8] : memref<8x16xf32, #tpu.memory_space<vmem>>, vector<8x16xf32>
    tpu.vector_store %arg2[%c0_7, %c0_8], %31 {strides = array<i32>} : memref<8x16xf32, #tpu.memory_space<vmem>>, vector<8x16xf32>,
    return
  }
  func.func @transform_0(%arg0: i32) -> (i32, i32) {
    %c0_i32 = arith.constant 0 : i32
    %c0_i32_0 = arith.constant 0 : i32
    return %arg0, %c0_i32 : i32, i32
  }
  func.func @transform_1(%arg0: i32) -> (i32, i32) {
    %c0_i32 = arith.constant 0 : i32
    %c0_i32_0 = arith.constant 0 : i32
    return %arg0, %c0_i32 : i32, i32
  }
  func.func @transform_2(%arg0: i32) -> (i32, i32) {
    %c0_i32 = arith.constant 0 : i32
    %c0_i32_0 = arith.constant 0 : i32
    return %arg0, %c0_i32 : i32, i32
  }
}

</mosaic_0001>

<bundles_post_ra>
// kernel: series_decomp_forward.1
= control target key start
LH: loop header
LB: loop body
LE: loop exit
PB: predicated region body
PF: predicated region fallthrough
CT: control target
= control target key end

     0   :  { %8 = vsyncpa [#allocation3], 0  ;;  %s233_s0 = inlined_call_operand.hbm [shape: f32[8,16], index: 0, kind: input, shape index: {}]   ;;  %s234_s1 = inlined_call_operand.hbm [shape: f32[8,16], index: 1, kind: output, shape index: {0}]   ;;  %s235_s2 = inlined_call_operand.hbm [shape: f32[8,16], index: 2, kind: output, shape index: {1}]  }
   0x1   :  { %9 = vsyncpa [#allocation4], 0 }
   0x2   :  { %10 = vsyncpa [#allocation7], 0  ;;  %s16_s11 = sshll.u32 %s233_s0, 4  ;;  %s199_s12 = smov [#allocation2]   ;;  %s17_s11 = int_to_ptr.hbm [resolvable:$true] %s16_s11 }
   0x3   :  { %s18_s13 = sshll.u32 %s199_s12, 4  ;;  %s19_s13 = int_to_ptr.vmem [resolvable:$true] %s18_s13 }
   0x4   :  { %21 = dma.hbm_to_vmem [thread:$0]  %s17_s11, 128, %s19_s13, [#allocation3]  }
   0x5   :  { %193 = dma.done.wait [#allocation3], 128  }
   0x6   :  { %194 = vsyncadd [#allocation3], 4294967168  ;;  %v26_v0 = vld [vmem:[#allocation2] sm:$0xff]  ;;  %s200_s14 = smov 16   ;;  %v201_v1 = vmov 15   ;;  %v202_v2 = vmov 0   ;;  %v27_v9 = vlaneseq }
   0x7   :  { %39 = vrot.lane.b32.xlu0 %v26_v0, %s200_s14  ;;  %118 = vset.pattern.permute.xlu1 %v201_v1  ;;  %vm38_vm0 = vcmask 1047680   ;;  %s203_s0 = smov 126   ;;  %s204_s15 = smov 113   ;;  %vm71_vm5 = vcmask 130048  }
   0x8   :  { %119 = vset.pattern.permute.xlu2 %v202_v2  ;;  %35 = vperm.xlu1 %118, %v26_v0   ;;  %s205_s16 = smov 127   ;;  %s206_s17 = smov 114   ;;  %v28_v10 = vand.u32 127, %v27_v9 }
   0x9   :  { %31 = vperm.xlu2 %119, %v26_v0   ;;  %120 = vset.pattern.permute.xlu0 %v201_v1  ;;  %s207_s18 = smov [#allocation6]   ;;  %s93_s22 = sshll.u32 %s235_s2, 4  ;;  %s94_s22 = int_to_ptr.hbm [resolvable:$true] %s93_s22 }
   0xa   :  { %vm45_vm1 = vcmp.lt.s32.totalorder %v28_v10, 15  ;;  %vm52_vm2 = vcmp.ge.s32.totalorder %v28_v10, 1  ;;  %vm58_vm3 = vcmp.lt.s32.totalorder %v28_v10, 14  ;;  %vm64_vm4 = vcmp.ge.s32.totalorder %v28_v10, 2  ;;  %s91_s19 = sshll.u32 %s207_s18, 4  ;;  %s208_s23 = smov [#allocation5]   ;;  %s92_s19 = int_to_ptr.vmem [resolvable:$true] %s91_s19 }
   0xb   :  { %s80_s24 = sshll.u32 %s208_s23, 4  ;;  %s82_s27 = sshll.u32 %s234_s1, 4  ;;  %s81_s24 = int_to_ptr.vmem [resolvable:$true] %s80_s24  ;;  %s83_s27 = int_to_ptr.hbm [resolvable:$true] %s82_s27 }
  0x63   :  { %v32_v7 = vpop.permute.xlu2 %31 }
  0x79   :  { %v40_v3 = vpop.permute.xlu0 %39 }
  0x7a   :  { %v41_v4 = vsel %vm38_vm0, %v40_v3, %v26_v0  ;;  %v36_v8 = vpop.permute.xlu1 %35 }
  0x7b   :  { %42 = vrot.lane.b32.xlu0 %v41_v4, %s200_s14 }
  0xed   :  { %v43_v5 = vpop.permute.xlu0 %42 }
  0xee   :  { %v44_v6 = vsel %vm38_vm0, %v43_v5, %v26_v0 }
  0xef   :  { %59 = vrot.lane.b32.xlu0 %v44_v6, %s203_s0  ;;  %53 = vrot.lane.b32.xlu2 %v44_v6, %s204_s15 }
  0xf0   :  { %47 = vrot.lane.b32.xlu1 %v44_v6, %s205_s16 }
  0xf8   :  { %65 = vrot.lane.b32.xlu1 %v44_v6, %s206_s17 }
 0x149   :  { %v54_v11 = vpop.permute.xlu2 %53 }
 0x14a   :  { %v56_v15 = vsel %vm52_vm2, %v54_v11, %v32_v7 }
 0x161   :  { %v60_v16 = vpop.permute.xlu0 %59 }
 0x162   :  { %v48_v12 = vpop.permute.xlu1 %47  ;;  %v62_v18 = vsel %vm58_vm3, %v60_v16, %v36_v8 }
 0x163   :  { %v50_v13 = vsel %vm45_vm1, %v48_v12, %v36_v8 }
 0x164   :  { %v51_v14 = vadd.f32 %v50_v13, %v26_v0 }
 0x166   :  { %v57_v17 = vadd.f32 %v56_v15, %v51_v14 }
 0x168   :  { %v63_v19 = vadd.f32 %v62_v18, %v57_v17 }
 0x16a   :  { %v66_v20 = vpop.permute.xlu1 %65 }
 0x16b   :  { %v68_v21 = vsel %vm64_vm4, %v66_v20, %v32_v7 }
 0x16c   :  { %v69_v22 = vadd.f32 %v68_v21, %v63_v19 }
 0x16e   :  { %v70_v23 = vmul.f32 0.2, %v69_v22 }
 0x170   :  { %v73_v24 = vsub.f32 %v26_v0, %v70_v23  ;;  %72 = vst.msk [vmem:[#allocation6] sm:$0xff] %vm71_vm5, %v70_v23 }
 0x171   :  { %96 = dma.vmem_to_hbm [thread:$0]  %s92_s19, 128, %s94_s22, [#allocation7]  }
 0x172   :  { %74 = vst.msk [vmem:[#allocation5] sm:$0xff] %vm71_vm5, %v73_v24 }
 0x173   :  { %85 = dma.vmem_to_hbm [thread:$0]  %s81_s24, 128, %s83_s27, [#allocation4]  }
 0x174   :  { %195 = dma.done.wait [#allocation4], 128  }
 0x175   :  { %196 = vsyncadd [#allocation4], 4294967168 }
 0x176   :  { %197 = dma.done.wait [#allocation7], 128  }
 0x177   :  { %198 = vsyncadd [#allocation7], 4294967168 }
 0x178   :  { %105 = vsyncpa [#allocation3], 1 }
 0x179   :  { %106 = vsyncpa [#allocation4], 1 }
 0x17a   :  { %107 = vsyncpa [#allocation7], 1 }

</bundles_post_ra>
